<compile_context>
chip_gen: v5e
topology: v5e:2x2
jax: 0.10.0
libtpu: 0.0.40
codegen_flags: <defaults>
</compile_context>

<pallas_src>
import functools

import jax
import jax.numpy as jnp
from jax import lax
from jax.experimental import pallas as pl
from jax.experimental.pallas import tpu as pltpu

EPS = 1e-6


def addnorm_kernel(x_ref, y_ref, gamma_ref, beta_ref, o_ref, *, eps, h_true):
    # TODO(synk): training-mode dropout (stochastic masking via pltpu.prng_*)
    # is not implemented; eval-mode dropout is the identity.
    s = x_ref[...].astype(jnp.float32) + y_ref[...].astype(jnp.float32)

    # Fused single-pass statistics over the last (hidden) dim, f32 accumulation.
    # Padded lanes (if any) are zero, so sums are unaffected; divide by the
    # true hidden size.
    inv_h = 1.0 / float(h_true)
    mean = jnp.sum(s, axis=-1, keepdims=True) * inv_h
    mean_sq = jnp.sum(s * s, axis=-1, keepdims=True) * inv_h
    var = jnp.maximum(mean_sq - mean * mean, 0.0)  # clamp cancellation noise
    inv_std = lax.rsqrt(var + eps)

    gamma = gamma_ref[...].astype(jnp.float32)   # (1, hidden_pad)
    beta = beta_ref[...].astype(jnp.float32)     # (1, hidden_pad)
    o_ref[...] = ((s - mean) * inv_std * gamma + beta).astype(o_ref.dtype)


def _vmem_capacity_bytes():
    """Physical VMEM per TensorCore; conservative fallback if query fails."""
    try:
        info = pltpu.get_tpu_info()
        cap = getattr(info, "vmem_capacity_bytes", None)
        if cap:
            return int(cap)
    except Exception:
        pass
    return 64 * 1024 * 1024  # v7x has the smallest VMEM (64 MiB)


def _packed_sublanes(dtype_bytes):
    """Sublanes per packed vreg tile for the dtype (8 f32, 16 bf16, 32 int8)."""
    if dtype_bytes >= 4:
        return 8
    if dtype_bytes == 2:
        return 16
    return 32


def _pick_row_tile(rows, hidden_pad, dtype_bytes, vmem_cap):
    """Largest row tile that fits the VMEM budget, capped at 512 rows."""
    sublane = _packed_sublanes(dtype_bytes)
    budget = int(vmem_cap * 0.6)
    # (x, y, out) x 2 pipeline buffers each, plus ~8 B/elem of f32 block
    # temporaries the compiler materializes for `s` / `s*s`.
    per_row_bytes = 6 * hidden_pad * dtype_bytes + 8 * hidden_pad
    tile = max(sublane, budget // max(per_row_bytes, 1))
    tile = min(tile, 512)   # ~85% of HBM roofline; more steps for pipelining
    tile = min(tile, rows)

    # Target >= 8 grid steps when rows allow, so each v7x core gets several
    # pipelined iterations (prefetch/writeback overlap) instead of one.
    target_steps = 8
    if rows >= target_steps * sublane:
        tile = min(tile, pl.cdiv(rows, target_steps))

    tile = max(sublane, (tile // sublane) * sublane)  # packed-sublane align
    return tile


def add_norm(x, y, gamma, beta, *, eps=EPS, row_tile=None):
    """x, y: (batch, seq, hidden); gamma, beta: (hidden,)."""
    assert x.shape == y.shape
    batch, seq, hidden = x.shape
    rows = batch * seq

    # Pad hidden up to a multiple of 128 so output stores are lane-dense
    # (unmasked vst). Typical transformer dims are already multiples of 128,
    # in which case this is a no-op.
    hidden_pad = ((hidden + 127) // 128) * 128
    pad = hidden_pad - hidden

    x2 = x.reshape(rows, hidden)
    y2 = y.reshape(rows, hidden)
    gamma2 = gamma.reshape(1, hidden)
    beta2 = beta.reshape(1, hidden)
    if pad:
        x2 = jnp.pad(x2, ((0, 0), (0, pad)))
        y2 = jnp.pad(y2, ((0, 0), (0, pad)))
        gamma2 = jnp.pad(gamma2, ((0, 0), (0, pad)))
        beta2 = jnp.pad(beta2, ((0, 0), (0, pad)))

    dtype_bytes = jnp.dtype(x.dtype).itemsize
    vmem_cap = _vmem_capacity_bytes()
    if row_tile is None:
        row_tile = _pick_row_tile(rows, hidden_pad, dtype_bytes, vmem_cap)

    # Ragged row counts are handled by Pallas boundary-block masking.
    grid_rows = pl.cdiv(rows, row_tile)

    cost = pl.CostEstimate(
        flops=int(10 * rows * hidden_pad),
        transcendentals=int(rows),
        bytes_accessed=int(3 * rows * hidden_pad * dtype_bytes
                           + 2 * hidden_pad * jnp.dtype(gamma.dtype).itemsize),
    )

    out2 = pl.pallas_call(
        functools.partial(addnorm_kernel, eps=eps, h_true=hidden),
        out_shape=jax.ShapeDtypeStruct((rows, hidden_pad), x.dtype),
        grid_spec=pltpu.PrefetchScalarGridSpec(
            num_scalar_prefetch=0,
            grid=(grid_rows,),
            in_specs=[
                pl.BlockSpec((row_tile, hidden_pad), lambda i: (i, 0)),
                pl.BlockSpec((row_tile, hidden_pad), lambda i: (i, 0)),
                pl.BlockSpec((1, hidden_pad), lambda i: (0, 0)),
                pl.BlockSpec((1, hidden_pad), lambda i: (0, 0)),
            ],
            out_specs=pl.BlockSpec((row_tile, hidden_pad), lambda i: (i, 0)),
        ),
        compiler_params=pltpu.CompilerParams(
            dimension_semantics=("parallel",),
            # Raise the scoped VMEM limit so the chosen tiles actually fit
            # (default scoped limit is well below physical VMEM).
            vmem_limit_bytes=int(vmem_cap * 0.75),
        ),
        cost_estimate=cost,
    )(x2, y2, gamma2, beta2)

    if pad:
        out2 = out2[:, :hidden]
    return out2.reshape(batch, seq, hidden)


def add_norm_ref(x, y, gamma, beta, eps=EPS):
    s = x + y
    mean = jnp.mean(s, axis=-1, keepdims=True)
    var = jnp.mean((s - mean) ** 2, axis=-1, keepdims=True)
    return (s - mean) * lax.rsqrt(var + eps) * gamma + beta


if __name__ == "__main__":
    batch, seq, hidden = 2, 8, 32

    key = jax.random.PRNGKey(0)
    kx, ky = jax.random.split(key)
    x = jax.random.normal(kx, (batch, seq, hidden), dtype=jnp.float32)
    y = jax.random.normal(ky, (batch, seq, hidden), dtype=jnp.float32)

    # Deterministic LayerNorm parameters (PyTorch init: gamma=1, beta=0).
    gamma = jnp.ones((hidden,), dtype=jnp.float32)
    beta = jnp.zeros((hidden,), dtype=jnp.float32)

    out = add_norm(x, y, gamma, beta)
    out = jax.block_until_ready(out)

    ref = add_norm_ref(x, y, gamma, beta)
    assert out.shape == (batch, seq, hidden)
    assert jnp.allclose(out, ref, atol=1e-5, rtol=1e-5), "mismatch vs reference"

    print("KERNEL_OK")
</pallas_src>

<mosaic_0001>
module attributes {stable_mosaic.version = 11 : i64} {
  func.func @addnorm_kernel(%arg0: i32, %arg1: memref<16x128xf32, #tpu.memory_space<vmem>>, %arg2: memref<16x128xf32, #tpu.memory_space<vmem>>, %arg3: memref<1x128xf32, #tpu.memory_space<vmem>>, %arg4: memref<1x128xf32, #tpu.memory_space<vmem>>, %arg5: memref<16x128xf32, #tpu.memory_space<vmem>>) attributes {dimension_semantics = [#tpu.dimension_semantics<parallel>], iteration_bounds = array<i64: 1>, scalar_prefetch = 0 : i64, scratch_operands = 0 : i64, tpu.core_type = #tpu.core_type<tc>, window_params = [{transform_indices = @transform_0, window_bounds = array<i64: 16, 128>}, {transform_indices = @transform_1, window_bounds = array<i64: 16, 128>}, {pipeline_mode = #tpu.pipeline_mode<synchronous>, transform_indices = @transform_2, window_bounds = array<i64: 1, 128>}, {pipeline_mode = #tpu.pipeline_mode<synchronous>, transform_indices = @transform_3, window_bounds = array<i64: 1, 128>}, {transform_indices = @transform_4, window_bounds = array<i64: 16, 128>}]} {
    %c0 = arith.constant 0 : index
    %c0_0 = arith.constant 0 : index
    %0 = vector.load %arg1[%c0, %c0_0] : memref<16x128xf32, #tpu.memory_space<vmem>>, vector<16x128xf32>
    %c0_1 = arith.constant 0 : index
    %c0_2 = arith.constant 0 : index
    %1 = vector.load %arg2[%c0_1, %c0_2] : memref<16x128xf32, #tpu.memory_space<vmem>>, vector<16x128xf32>
    %2 = arith.addf %0, %1 : vector<16x128xf32>
    %cst = arith.constant dense<0.000000e+00> : vector<16xf32>
    %3 = vector.multi_reduction <add>, %2, %cst [1] : vector<16x128xf32> to vector<16xf32>
    %4 = vector.shape_cast %3 : vector<16xf32> to vector<16x1xf32>
    %cst_3 = arith.constant 3.125000e-02 : f32
    %5 = vector.broadcast %cst_3 : f32 to vector<16x1xf32>
    %6 = arith.mulf %4, %5 : vector<16x1xf32>
    %7 = arith.mulf %2, %2 : vector<16x128xf32>
    %cst_4 = arith.constant dense<0.000000e+00> : vector<16xf32>
    %8 = vector.multi_reduction <add>, %7, %cst_4 [1] : vector<16x128xf32> to vector<16xf32>
    %9 = vector.shape_cast %8 : vector<16xf32> to vector<16x1xf32>
    %cst_5 = arith.constant 3.125000e-02 : f32
    %10 = vector.broadcast %cst_5 : f32 to vector<16x1xf32>
    %11 = arith.mulf %9, %10 : vector<16x1xf32>
    %12 = arith.mulf %6, %6 : vector<16x1xf32>
    %13 = arith.subf %11, %12 : vector<16x1xf32>
    %cst_6 = arith.constant 0.000000e+00 : f32
    %14 = vector.broadcast %cst_6 : f32 to vector<16x1xf32>
    %15 = arith.maximumf %13, %14 : vector<16x1xf32>
    %cst_7 = arith.constant 9.99999997E-7 : f32
    %16 = vector.broadcast %cst_7 : f32 to vector<16x1xf32>
    %17 = arith.addf %15, %16 : vector<16x1xf32>
    %18 = math.rsqrt %17 : vector<16x1xf32>
    %c0_8 = arith.constant 0 : index
    %c0_9 = arith.constant 0 : index
    %19 = vector.load %arg3[%c0_8, %c0_9] : memref<1x128xf32, #tpu.memory_space<vmem>>, vector<1x128xf32>
    %c0_10 = arith.constant 0 : index
    %c0_11 = arith.constant 0 : index
    %20 = vector.load %arg4[%c0_10, %c0_11] : memref<1x128xf32, #tpu.memory_space<vmem>>, vector<1x128xf32>
    %21 = vector.broadcast %6 : vector<16x1xf32> to vector<16x128xf32>
    %22 = arith.subf %2, %21 : vector<16x128xf32>
    %23 = vector.broadcast %18 : vector<16x1xf32> to vector<16x128xf32>
    %24 = arith.mulf %22, %23 : vector<16x128xf32>
    %25 = vector.broadcast %19 : vector<1x128xf32> to vector<16x128xf32>
    %26 = arith.mulf %24, %25 : vector<16x128xf32>
    %27 = vector.broadcast %20 : vector<1x128xf32> to vector<16x128xf32>
    %28 = arith.addf %26, %27 : vector<16x128xf32>
    %c0_12 = arith.constant 0 : index
    %c0_13 = arith.constant 0 : index
    %29 = vector.load %arg5[%c0_12, %c0_13] : memref<16x128xf32, #tpu.memory_space<vmem>>, vector<16x128xf32>
    tpu.vector_store %arg5[%c0_12, %c0_13], %28 {strides = array<i32>} : memref<16x128xf32, #tpu.memory_space<vmem>>, vector<16x128xf32>,
    return
  }
  func.func @transform_0(%arg0: i32) -> (i32, i32) {
    %c0_i32 = arith.constant 0 : i32
    %c0_i32_0 = arith.constant 0 : i32
    return %arg0, %c0_i32 : i32, i32
  }
  func.func @transform_1(%arg0: i32) -> (i32, i32) {
    %c0_i32 = arith.constant 0 : i32
    %c0_i32_0 = arith.constant 0 : i32
    return %arg0, %c0_i32 : i32, i32
  }
  func.func @transform_2(%arg0: i32) -> (i32, i32) {
    %c0_i32 = arith.constant 0 : i32
    %c0_i32_0 = arith.constant 0 : i32
    %c0_i32_1 = arith.constant 0 : i32
    return %c0_i32, %c0_i32_0 : i32, i32
  }
  func.func @transform_3(%arg0: i32) -> (i32, i32) {
    %c0_i32 = arith.constant 0 : i32
    %c0_i32_0 = arith.constant 0 : i32
    %c0_i32_1 = arith.constant 0 : i32
    return %c0_i32, %c0_i32_0 : i32, i32
  }
  func.func @transform_4(%arg0: i32) -> (i32, i32) {
    %c0_i32 = arith.constant 0 : i32
    %c0_i32_0 = arith.constant 0 : i32
    return %arg0, %c0_i32 : i32, i32
  }
}

</mosaic_0001>

<bundles_post_ra>
// kernel: tpu_custom_call.1
= control target key start
LH: loop header
LB: loop body
LE: loop exit
PB: predicated region body
PF: predicated region fallthrough
CT: control target
= control target key end

     0   :  { %9 = vsyncpa [#allocation3], 0  ;;  %s279_s0 = inlined_call_operand.hbm [shape: f32[16,128], index: 0, kind: input, shape index: {}]   ;;  %s280_s1 = inlined_call_operand.hbm [shape: f32[16,128], index: 1, kind: input, shape index: {}]   ;;  %s281_s2 = inlined_call_operand.vmem [shape: f32[1,128], index: 2, kind: input, shape index: {}]   ;;  %s282_s3 = inlined_call_operand.vmem [shape: f32[1,128], index: 3, kind: input, shape index: {}]   ;;  %s283_s4 = inlined_call_operand.hbm [shape: f32[16,128], index: 4, kind: output, shape index: {}]  }
   0x1   :  { %10 = vsyncpa [#allocation6], 0 }
   0x2   :  { %11 = vsyncpa [#allocation4], 0  ;;  %s16_s17 = sshll.u32 %s279_s0, 4  ;;  %s225_s18 = smov [#allocation2]   ;;  %s17_s17 = int_to_ptr.hbm [resolvable:$true] %s16_s17 }
   0x3   :  { %s18_s19 = sshll.u32 %s225_s18, 4  ;;  %s29_s22 = sshll.u32 %s280_s1, 4  ;;  %s19_s19 = int_to_ptr.vmem [resolvable:$true] %s18_s19  ;;  %s30_s22 = int_to_ptr.hbm [resolvable:$true] %s29_s22 }
   0x4   :  { %s226_s23 = smov 128   ;;  %s227_s24 = smov 8  }
   0x5   :  { %24 = dma.hbm_to_vmem [thread:$0]  %s17_s17, 256, %s19_s19, [#allocation3], %s226_s23, %s226_s23, %s227_s24  }
   0x6   :  { %s228_s25 = smov [#allocation5]  }
   0x7   :  { %s31_s26 = sshll.u32 %s228_s25, 4  ;;  %s32_s26 = int_to_ptr.vmem [resolvable:$true] %s31_s26 }
   0x8   :  { %37 = dma.hbm_to_vmem [thread:$0]  %s30_s22, 256, %s32_s26, [#allocation6], %s226_s23, %s226_s23, %s227_s24  }
   0x9   :  { %219 = dma.done.wait [#allocation3], 256  }
   0xa   :  { %220 = vsyncadd [#allocation3], 4294967040 }
   0xb   :  { %221 = dma.done.wait [#allocation6], 256  }
   0xc   :  { %222 = vsyncadd [#allocation6], 4294967040  ;;  %v50_v0 = vld [vmem:[#allocation2] sm:$0xff]  ;;  %v52_v1 = vld [vmem:[#allocation5] sm:$0xff]  ;;  %s122_s6 = sshll.u32 %s283_s4, 4  ;;  %s123_s6 = int_to_ptr.hbm [resolvable:$true] %s122_s6 }
   0xd   :  { %v54_v2 = vadd.f32 %v52_v1, %v50_v0  ;;  %v51_v3 = vld [vmem:[#allocation2 + $0x8] sm:$0xff]  ;;  %v53_v4 = vld [vmem:[#allocation5 + $0x8] sm:$0xff]  ;;  %v141_v33 = vld [vmem:[%s281_s2] ss:$0 sm:$0xff]  ;;  %s229_s2 = smov [#allocation7]  }
   0xe   :  { %v55_v6 = vadd.f32 %v53_v4, %v51_v3  ;;  %v142_v37 = vld [vmem:[%s282_s3] ss:$0 sm:$0xff]  ;;  %s120_s29 = sshll.u32 %s229_s2, 4  ;;  %s121_s29 = int_to_ptr.vmem [resolvable:$true] %s120_s29 }
   0xf   :  { %56 = vadd.xlane.f32.xlu0 %v54_v2  ;;  %v62_v5 = vmul.f32 %v54_v2, %v54_v2 }
  0x10   :  { %v63_v7 = vmul.f32 %v55_v6, %v55_v6 }
  0x11   :  { %64 = vadd.xlane.f32.xlu1 %v62_v5 }
  0x17   :  { %58 = vadd.xlane.f32.xlu0 %v55_v6 }
  0x19   :  { %66 = vadd.xlane.f32.xlu1 %v63_v7 }
  0x82   :  { %v57_v8 = vpop.xlane.xlu0 %56 }
  0x83   :  { %v60_v9 = vmul.f32 0.03125, %v57_v8 }
  0x84   :  { %v65_v10 = vpop.xlane.xlu1 %64 }
  0x85   :  { %v70_v11 = vmul.f32 %v60_v9, %v60_v9  ;;  %v68_v12 = vmul.f32 0.03125, %v65_v10  ;;  %v100_v31 = vsub.f32 %v54_v2, %v60_v9 }
  0x87   :  { %v72_v13 = vsub.f32 %v68_v12, %v70_v11 }
  0x89   :  { %v74_v14 = vmax.f32 %v72_v13, 0.0 }
  0x8a   :  { %v59_v15 = vpop.xlane.xlu0 %58 }
  0x8b   :  { %v76_v16 = vadd.f32 1e-06, %v74_v14  ;;  %v61_v17 = vmul.f32 0.03125, %v59_v15 }
  0x8c   :  { %v67_v18 = vpop.xlane.xlu1 %66 }
  0x8d   :  { %143 = vrsqrt.f32 %v76_v16  ;;  %v71_v19 = vmul.f32 %v61_v17, %v61_v17  ;;  %v69_v20 = vmul.f32 0.03125, %v67_v18  ;;  %vm84_vm1 = vweird.f32 %v76_v16 }
  0x8e   :  { %v101_v43 = vsub.f32 %v55_v6, %v61_v17 }
  0x8f   :  { %v73_v21 = vsub.f32 %v69_v20, %v71_v19 }
  0x91   :  { %v75_v22 = vmax.f32 %v73_v21, 0.0 }
  0x93   :  { %v144_v23 = vpop.eup %143  ;;  %v77_v25 = vadd.f32 1e-06, %v75_v22 }
  0x94   :  { %v79_v24 = vmul.f32 %v144_v23, %v76_v16  ;;  %vm85_vm0 = vweird.f32 %v144_v23 }
  0x95   :  { %145 = vrsqrt.f32 %v77_v25  ;;  %vm86_vm2 = vmor %vm84_vm1, %vm85_vm0  ;;  %vm94_vm4 = vweird.f32 %v77_v25 }
  0x96   :  { %v80_v26 = vmul.f32 %v144_v23, %v79_v24 }
  0x98   :  { %v81_v27 = vmul.f32 0.5, %v80_v26 }
  0x9a   :  { %v82_v28 = vsub.f32 1.5, %v81_v27 }
  0x9b   :  { %v146_v29 = vpop.eup %145 }
  0x9c   :  { %v83_v30 = vmul.f32 %v144_v23, %v82_v28  ;;  %v89_v32 = vmul.f32 %v146_v29, %v77_v25  ;;  %vm95_vm3 = vweird.f32 %v146_v29 }
  0x9d   :  { %vm96_vm5 = vmor %vm94_vm4, %vm95_vm3 }
  0x9e   :  { %v87_v34 = vsel %vm86_vm2, %v144_v23, %v83_v30  ;;  %v90_v35 = vmul.f32 %v146_v29, %v89_v32 }
  0x9f   :  { %v102_v36 = vmul.f32 %v100_v31, %v87_v34 }
  0xa0   :  { %v91_v38 = vmul.f32 0.5, %v90_v35 }
  0xa1   :  { %v107_v39 = vmul.f32 %v141_v33, %v102_v36 }
  0xa2   :  { %v92_v40 = vsub.f32 1.5, %v91_v38 }
  0xa3   :  { %v112_v41 = vadd.f32 %v142_v37, %v107_v39 }
  0xa4   :  { %v93_v42 = vmul.f32 %v146_v29, %v92_v40 }
  0xa5   :  { %114 = vst [vmem:[#allocation7] sm:$0xff] %v112_v41 }
  0xa6   :  { %v97_v44 = vsel %vm96_vm5, %v146_v29, %v93_v42 }
  0xa7   :  { %v103_v45 = vmul.f32 %v101_v43, %v97_v44 }
  0xa9   :  { %v108_v46 = vmul.f32 %v141_v33, %v103_v45 }
  0xab   :  { %v113_v47 = vadd.f32 %v142_v37, %v108_v46 }
  0xad   :  { %115 = vst [vmem:[#allocation7 + $0x8] sm:$0xff] %v113_v47 }
  0xae   :  { %128 = dma.vmem_to_hbm [thread:$0]  %s121_s29, 256, %s123_s6, [#allocation4], %s226_s23, %s226_s23, %s227_s24  }
  0xaf   :  { %223 = dma.done.wait [#allocation4], 256  }
  0xb0   :  { %224 = vsyncadd [#allocation4], 4294967040 }
  0xb1   :  { %133 = vsyncpa [#allocation3], 1 }
  0xb2   :  { %134 = vsyncpa [#allocation6], 1 }
  0xb3   :  { %135 = vsyncpa [#allocation4], 1 }

</bundles_post_ra>
